<compile_context>
chip_gen: v6e
topology: v6e:2x2x1
jax: 0.10.0
libtpu: 0.0.40
codegen_flags: <defaults>
</compile_context>

<pallas_src>
import math
import functools

import jax
import jax.numpy as jnp
from jax.experimental import pallas as pl
from jax.experimental.pallas import tpu as pltpu


# MXU / inter-kernel activation dtype; accumulation + softmax + LN stats are f32.
MXU_DTYPE = jnp.bfloat16
WEIGHT_DTYPE = jnp.bfloat16
ACT_DTYPE = jnp.bfloat16
LN_EPS = 1e-5


def _default_vmem_limit():
    # ~3/4 of physical VMEM per TensorCore: ~48 MiB on v7x, ~96 MiB on v5e/v6e.
    try:
        info = pltpu.get_tpu_info()
        cap = int(getattr(info, "vmem_capacity_bytes", 128 << 20))
    except Exception:
        cap = 128 << 20
    return int(min(cap * 3 // 4, 100 << 20))


_VMEM_LIMIT = _default_vmem_limit()


def _cparams(dims):
    return pltpu.CompilerParams(dimension_semantics=dims,
                                vmem_limit_bytes=_VMEM_LIMIT)


# ----------------------------------------------------------------------------
# Pallas kernels
# ----------------------------------------------------------------------------
def _layernorm(z, g, b):
    mean = jnp.mean(z, axis=-1, keepdims=True)
    var = jnp.mean(jnp.square(z - mean), axis=-1, keepdims=True)
    return (z - mean) * jax.lax.rsqrt(var + LN_EPS) * g + b


def _linear_kernel(x_ref, w_ref, b_ref, o_ref):
    acc = jnp.dot(x_ref[...].astype(MXU_DTYPE), w_ref[...],
                  preferred_element_type=jnp.float32)
    o_ref[...] = (acc + b_ref[...]).astype(o_ref.dtype)


def linear(x, w, b, *, tile_m=512, tile_n=1024, out_dtype=ACT_DTYPE):
    """x:(M,K) @ w:(K,N) + b:(1,N) -> (M,N).

    Grid is (N-tiles outer, M-tiles inner): the bf16 weight column tile has a
    constant block index across the inner axis, so it is DMAed once per column
    tile while small activation row tiles stream — key for the vocab
    projection where W_out is the dominant HBM traffic.
    """
    M, K = x.shape
    N = w.shape[1]
    tm = min(tile_m, M)
    tn = min(tile_n, N)
    grid = (pl.cdiv(N, tn), pl.cdiv(M, tm))
    return pl.pallas_call(
        _linear_kernel,
        out_shape=jax.ShapeDtypeStruct((M, N), out_dtype),
        grid=grid,
        in_specs=[pl.BlockSpec((tm, K), lambda n, m: (m, 0)),
                  pl.BlockSpec((K, tn), lambda n, m: (0, n)),
                  pl.BlockSpec((1, tn), lambda n, m: (0, n))],
        out_specs=pl.BlockSpec((tm, tn), lambda n, m: (m, n)),
        compiler_params=_cparams(("parallel", "parallel")),
    )(x, w, b)


def _out_proj_add_ln_kernel(o_ref, w_ref, b_ref, x_ref, g_ref, bln_ref, y_ref):
    # attention-head output @ Wo + bo, then residual add + LayerNorm epilogue.
    y = jnp.dot(o_ref[...].astype(MXU_DTYPE), w_ref[...],
                preferred_element_type=jnp.float32) + b_ref[...]
    z = x_ref[...].astype(jnp.float32) + y          # residual (dropout p=0)
    y_ref[...] = _layernorm(z, g_ref[...], bln_ref[...]).astype(y_ref.dtype)


def out_proj_add_ln(o2d, Wo, bo, x2d, gamma, beta, *, tile_m=512):
    M, H = o2d.shape
    tm = min(tile_m, M)
    return pl.pallas_call(
        _out_proj_add_ln_kernel,
        out_shape=jax.ShapeDtypeStruct((M, H), ACT_DTYPE),
        grid=(pl.cdiv(M, tm),),
        in_specs=[pl.BlockSpec((tm, H), lambda i: (i, 0)),
                  pl.BlockSpec((H, H), lambda i: (0, 0)),
                  pl.BlockSpec((1, H), lambda i: (0, 0)),
                  pl.BlockSpec((tm, H), lambda i: (i, 0)),
                  pl.BlockSpec((1, H), lambda i: (0, 0)),
                  pl.BlockSpec((1, H), lambda i: (0, 0))],
        out_specs=pl.BlockSpec((tm, H), lambda i: (i, 0)),
        compiler_params=_cparams(("parallel",)),
    )(o2d, Wo, bo, x2d, gamma, beta)


def _ffn_add_ln_kernel(x_ref, w1_ref, b1_ref, w2_ref, b2_ref, g_ref, bln_ref,
                       y_ref):
    x = x_ref[...]
    h = jnp.dot(x.astype(MXU_DTYPE), w1_ref[...],
                preferred_element_type=jnp.float32) + b1_ref[...]
    h = jnp.maximum(h, 0.0)                         # ReLU
    y = jnp.dot(h.astype(MXU_DTYPE), w2_ref[...],
                preferred_element_type=jnp.float32) + b2_ref[...]
    z = x.astype(jnp.float32) + y                   # residual (dropout p=0)
    y_ref[...] = _layernorm(z, g_ref[...], bln_ref[...]).astype(y_ref.dtype)


def ffn_add_ln(x2d, p, gamma, beta, *, tile_m=512):
    """Fused PositionwiseFFN + AddNorm on a [rows, H] slab (bf16 weights)."""
    M, H = x2d.shape
    F = p["w1"].shape[1]
    tm = min(tile_m, M)
    return pl.pallas_call(
        _ffn_add_ln_kernel,
        out_shape=jax.ShapeDtypeStruct((M, H), ACT_DTYPE),
        grid=(pl.cdiv(M, tm),),
        in_specs=[pl.BlockSpec((tm, H), lambda i: (i, 0)),
                  pl.BlockSpec((H, F), lambda i: (0, 0)),
                  pl.BlockSpec((1, F), lambda i: (0, 0)),
                  pl.BlockSpec((F, H), lambda i: (0, 0)),
                  pl.BlockSpec((1, H), lambda i: (0, 0)),
                  pl.BlockSpec((1, H), lambda i: (0, 0)),
                  pl.BlockSpec((1, H), lambda i: (0, 0))],
        out_specs=pl.BlockSpec((tm, H), lambda i: (i, 0)),
        compiler_params=_cparams(("parallel",)),
    )(x2d, p["w1"], p["b1"], p["w2"], p["b2"], gamma, beta)


def _attention_kernel(q_ref, k_ref, v_ref, m_ref, o_ref):
    # One (batch, head, q-tile) per grid step.
    # q:(1,1,tq,hd)  k,v:(1,1,Sk,hd)  m:(1,tq,Sk)
    q = q_ref[0, 0].astype(MXU_DTYPE)
    k = k_ref[0, 0].astype(MXU_DTYPE)
    v = v_ref[0, 0].astype(MXU_DTYPE)
    # QK^T via dot_general contraction on the last dims (no explicit K.T);
    # the 1/sqrt(head_dim) scale is folded into Wq/bq.
    s = jax.lax.dot_general(q, k, (((1,), (1,)), ((), ())),
                            preferred_element_type=jnp.float32)  # (tq, Sk)
    s = s + m_ref[0]                              # additive mask (0 / -1e9), f32
    s = s - jnp.max(s, axis=-1, keepdims=True)
    p = jnp.exp(s)
    p = p * pl.reciprocal(jnp.sum(p, axis=-1, keepdims=True), approx=True)
    o = jnp.dot(p.astype(MXU_DTYPE), v, preferred_element_type=jnp.float32)
    o_ref[0, 0] = o.astype(o_ref.dtype)


def sdp_attention(q, k, v, mask, *, tile_q=256):
    """q:(B,nH,Sq,hd) k,v:(B,nH,Sk,hd) mask:(B,Sq,Sk) additive -> (B,nH,Sq,hd).

    Grid over (batch, head, q-tile), all "parallel": bounds per-step score VMEM
    to (tile_q, Sk) f32, keeps K/V resident across the inner q-tile axis and
    exposes enough parallel work for v7x's two TensorCores at small batch.
    """
    B, nH, Sq, hd = q.shape
    Sk = k.shape[2]
    tq = min(tile_q, Sq)
    grid = (B, nH, pl.cdiv(Sq, tq))
    return pl.pallas_call(
        _attention_kernel,
        out_shape=jax.ShapeDtypeStruct((B, nH, Sq, hd), ACT_DTYPE),
        grid=grid,
        in_specs=[pl.BlockSpec((1, 1, tq, hd), lambda b, h, qi: (b, h, qi, 0)),
                  pl.BlockSpec((1, 1, Sk, hd), lambda b, h, qi: (b, h, 0, 0)),
                  pl.BlockSpec((1, 1, Sk, hd), lambda b, h, qi: (b, h, 0, 0)),
                  pl.BlockSpec((1, tq, Sk), lambda b, h, qi: (b, qi, 0))],
        out_specs=pl.BlockSpec((1, 1, tq, hd), lambda b, h, qi: (b, h, qi, 0)),
        compiler_params=_cparams(("parallel", "parallel", "parallel")),
    )(q, k, v, mask)


# ----------------------------------------------------------------------------
# Glue (plain JAX): embedding, positional encoding, head split/merge, masks
# ----------------------------------------------------------------------------
def positional_encoding(S, H):
    # assumes even H (matches d2l PositionalEncoding)
    pos = jnp.arange(S, dtype=jnp.float32)[:, None]
    i = jnp.arange(0, H, 2, dtype=jnp.float32)[None, :]
    angle = pos / jnp.power(10000.0, i / H)
    pe = jnp.zeros((S, H), jnp.float32)
    pe = pe.at[:, 0::2].set(jnp.sin(angle))
    pe = pe.at[:, 1::2].set(jnp.cos(angle))
    return pe


def length_mask(valid_lens, Sq, Sk):
    """(B, Sq, Sk) additive mask: key index >= valid_len -> -1e9."""
    # TODO(synk): d2l masked_softmax also accepts 2-D per-query valid lengths.
    k_ids = jnp.arange(Sk)[None, None, :]
    m = jnp.where(k_ids < valid_lens[:, None, None], 0.0, -1e9)
    return jnp.broadcast_to(m, (valid_lens.shape[0], Sq, Sk)).astype(jnp.float32)


def causal_mask(B, S):
    q = jnp.arange(S)[:, None]
    k = jnp.arange(S)[None, :]
    m = jnp.where(k <= q, 0.0, -1e9).astype(jnp.float32)
    return jnp.broadcast_to(m[None], (B, S, S))


def split_heads(x, nH):
    B, S, H = x.shape
    return x.reshape(B, S, nH, H // nH).transpose(0, 2, 1, 3)   # (B,nH,S,hd)


def merge_heads(x):
    B, nH, S, hd = x.shape
    return x.transpose(0, 2, 1, 3).reshape(B, S, nH * hd)


def attention_block(attn_p, ln_g, ln_b, q_in, kv_in, mask, nH, *, cross):
    """MHA (fused QKV / KV projections) + fused output-proj + AddNorm."""
    B, Sq, H = q_in.shape
    if cross:
        q = linear(q_in.reshape(-1, H), attn_p["Wq"], attn_p["bq"]).reshape(B, Sq, H)
        Sk = kv_in.shape[1]
        kv = linear(kv_in.reshape(-1, H), attn_p["Wkv"], attn_p["bkv"]).reshape(B, Sk, 2 * H)
        k, v = kv[..., :H], kv[..., H:]
    else:
        qkv = linear(q_in.reshape(-1, H), attn_p["Wqkv"], attn_p["bqkv"]).reshape(B, Sq, 3 * H)
        q, k, v = qkv[..., :H], qkv[..., H:2 * H], qkv[..., 2 * H:]
    # TODO(synk): for head_dim multiples of 128, read per-head slices of the
    #             packed slab directly in sdp_attention and drop these passes.
    oh = sdp_attention(split_heads(q, nH), split_heads(k, nH), split_heads(v, nH), mask)
    o2d = merge_heads(oh).reshape(-1, H)
    y = out_proj_add_ln(o2d, attn_p["Wo"], attn_p["bo"],
                        q_in.reshape(-1, H), ln_g, ln_b)
    return y.reshape(B, Sq, H)


# ----------------------------------------------------------------------------
# Transformer encoder / decoder and EncoderDecoder.forward
# ----------------------------------------------------------------------------
def transformer_encoder(p, tokens, enc_valid_lens, nH):
    B, S = tokens.shape
    H = p["embedding"].shape[1]
    X = jnp.take(p["embedding"], tokens, axis=0) * math.sqrt(H)
    X = (X + positional_encoding(S, H)[None]).astype(ACT_DTYPE)
    mask = length_mask(enc_valid_lens, S, S)
    for blk in p["blocks"]:
        X = attention_block(blk["attn"], blk["ln1_g"], blk["ln1_b"],
                            X, X, mask, nH, cross=False)
        X = ffn_add_ln(X.reshape(-1, H), blk["ffn"],
                       blk["ln2_g"], blk["ln2_b"]).reshape(B, S, H)
    return X


def decoder_init_state(enc_outputs, enc_valid_lens, num_layers):
    return [enc_outputs, enc_valid_lens, [None] * num_layers]


def transformer_decoder(p, tokens, state, nH):
    enc_outputs, enc_valid_lens, _ = state
    B, S = tokens.shape
    H = p["embedding"].shape[1]
    Se = enc_outputs.shape[1]
    X = jnp.take(p["embedding"], tokens, axis=0) * math.sqrt(H)
    X = (X + positional_encoding(S, H)[None]).astype(ACT_DTYPE)
    self_mask = causal_mask(B, S)                 # training-mode causal valid lens
    cross_mask = length_mask(enc_valid_lens, S, Se)
    for blk in p["blocks"]:
        X1 = attention_block(blk["attn1"], blk["ln1_g"], blk["ln1_b"],
                             X, X, self_mask, nH, cross=False)
        X2 = attention_block(blk["attn2"], blk["ln2_g"], blk["ln2_b"],
                             X1, enc_outputs, cross_mask, nH, cross=True)
        X = ffn_add_ln(X2.reshape(-1, H), blk["ffn"],
                       blk["ln3_g"], blk["ln3_b"]).reshape(B, S, H)
    logits = linear(X.reshape(-1, H), p["W_out"], p["b_out"],
                    out_dtype=jnp.float32).reshape(B, S, -1)
    return logits, state


def encoder_decoder_forward(params, enc_X, dec_X, enc_valid_lens, nH, num_layers):
    """Mirror of EncoderDecoder.forward."""
    enc_outputs = transformer_encoder(params["encoder"], enc_X, enc_valid_lens, nH)
    dec_state = decoder_init_state(enc_outputs, enc_valid_lens, num_layers)
    return transformer_decoder(params["decoder"], dec_X, dec_state, nH)


# ----------------------------------------------------------------------------
# Deterministic parameter init.  Matmul weights stored bf16 (MXU dtype) in HBM;
# biases / LayerNorm params / embedding stay f32.  QKV / KV weights pre-fused,
# 1/sqrt(head_dim) score scale folded into the Q projection.
# ----------------------------------------------------------------------------
def init_params(key, vocab_size, H, F, nH, num_layers):
    ks = iter(jax.random.split(key, 1024))
    hd_scale = 1.0 / math.sqrt(H // nH)

    def w(shape, scale=0.02):
        return jax.random.normal(next(ks), shape, jnp.float32) * scale

    def zeros(shape):
        return jnp.zeros(shape, jnp.float32)

    def ones(shape):
        return jnp.ones(shape, jnp.float32)

    def self_attn_params():
        Wq, Wk, Wv = w((H, H)), w((H, H)), w((H, H))
        bq, bk, bv = zeros((1, H)), zeros((1, H)), zeros((1, H))
        return {"Wqkv": jnp.concatenate([Wq * hd_scale, Wk, Wv], axis=1).astype(WEIGHT_DTYPE),
                "bqkv": jnp.concatenate([bq * hd_scale, bk, bv], axis=1),
                "Wo": w((H, H)).astype(WEIGHT_DTYPE), "bo": zeros((1, H))}

    def cross_attn_params():
        Wq, Wk, Wv = w((H, H)), w((H, H)), w((H, H))
        bq, bk, bv = zeros((1, H)), zeros((1, H)), zeros((1, H))
        return {"Wq": (Wq * hd_scale).astype(WEIGHT_DTYPE), "bq": bq * hd_scale,
                "Wkv": jnp.concatenate([Wk, Wv], axis=1).astype(WEIGHT_DTYPE),
                "bkv": jnp.concatenate([bk, bv], axis=1),
                "Wo": w((H, H)).astype(WEIGHT_DTYPE), "bo": zeros((1, H))}

    def ffn_params():
        return {"w1": w((H, F)).astype(WEIGHT_DTYPE), "b1": zeros((1, F)),
                "w2": w((F, H)).astype(WEIGHT_DTYPE), "b2": zeros((1, H))}

    enc_blocks = [{"attn": self_attn_params(),
                   "ln1_g": ones((1, H)), "ln1_b": zeros((1, H)),
                   "ffn": ffn_params(),
                   "ln2_g": ones((1, H)), "ln2_b": zeros((1, H))}
                  for _ in range(num_layers)]
    dec_blocks = [{"attn1": self_attn_params(),
                   "ln1_g": ones((1, H)), "ln1_b": zeros((1, H)),
                   "attn2": cross_attn_params(),
                   "ln2_g": ones((1, H)), "ln2_b": zeros((1, H)),
                   "ffn": ffn_params(),
                   "ln3_g": ones((1, H)), "ln3_b": zeros((1, H))}
                  for _ in range(num_layers)]
    encoder = {"embedding": w((vocab_size, H), 1.0 / math.sqrt(H)),
               "blocks": enc_blocks}
    decoder = {"embedding": w((vocab_size, H), 1.0 / math.sqrt(H)),
               "blocks": dec_blocks,
               "W_out": w((H, vocab_size)).astype(WEIGHT_DTYPE),
               "b_out": zeros((1, vocab_size))}
    return {"encoder": encoder, "decoder": decoder}


# ----------------------------------------------------------------------------
if __name__ == "__main__":
    B, S, H, nH, F, V, L = 2, 8, 32, 2, 64, 16, 2

    key = jax.random.PRNGKey(0)
    k_enc, k_dec, k_par = jax.random.split(key, 3)
    enc_X = jax.random.randint(k_enc, (B, S), 0, V, dtype=jnp.int32)
    dec_X = jax.random.randint(k_dec, (B, S), 0, V, dtype=jnp.int32)
    enc_valid_lens = jnp.array([S, 5], dtype=jnp.int32)

    params = init_params(k_par, V, H, F, nH, L)

    fwd = jax.jit(functools.partial(encoder_decoder_forward, nH=nH, num_layers=L))
    logits, state = fwd(params, enc_X, dec_X, enc_valid_lens)
    logits = jax.block_until_ready(logits)

    assert logits.shape == (B, S, V), logits.shape
    assert not bool(jnp.isnan(logits).any())
    print("KERNEL_OK")
</pallas_src>

<mosaic_0001>
module attributes {stable_mosaic.version = 11 : i64} {
  func.func @_linear_kernel(%arg0: i32, %arg1: i32, %arg2: memref<16x32xbf16, #tpu.memory_space<vmem>>, %arg3: memref<32x96xbf16, #tpu.memory_space<vmem>>, %arg4: memref<1x96xf32, #tpu.memory_space<vmem>>, %arg5: memref<16x96xbf16, #tpu.memory_space<vmem>>) attributes {dimension_semantics = [#tpu.dimension_semantics<parallel>, #tpu.dimension_semantics<parallel>], iteration_bounds = array<i64: 1, 1>, scalar_prefetch = 0 : i64, scratch_operands = 0 : i64, tpu.core_type = #tpu.core_type<tc>, window_params = [{transform_indices = @transform_0, window_bounds = array<i64: 16, 32>}, {transform_indices = @transform_1, window_bounds = array<i64: 32, 96>}, {transform_indices = @transform_2, window_bounds = array<i64: 1, 96>}, {transform_indices = @transform_3, window_bounds = array<i64: 16, 96>}]} {
    %c0 = arith.constant 0 : index
    %c0_0 = arith.constant 0 : index
    %0 = vector.load %arg2[%c0, %c0_0] : memref<16x32xbf16, #tpu.memory_space<vmem>>, vector<16x32xbf16>
    %c0_1 = arith.constant 0 : index
    %c0_2 = arith.constant 0 : index
    %1 = vector.load %arg3[%c0_1, %c0_2] : memref<32x96xbf16, #tpu.memory_space<vmem>>, vector<32x96xbf16>
    %cst = arith.constant dense<0.000000e+00> : vector<16x96xf32>
    %2 = tpu.matmul %0, %1, %cst {dimension_numbers = #tpu.dot_dimension_numbers<[1], [0], [0], [1], [0, 0, 1, 1], [], []>} : vector<16x32xbf16>, vector<32x96xbf16>, vector<16x96xf32> -> vector<16x96xf32>
    %c0_3 = arith.constant 0 : index
    %c0_4 = arith.constant 0 : index
    %3 = vector.load %arg4[%c0_3, %c0_4] : memref<1x96xf32, #tpu.memory_space<vmem>>, vector<1x96xf32>
    %4 = vector.broadcast %3 : vector<1x96xf32> to vector<16x96xf32>
    %5 = arith.addf %2, %4 : vector<16x96xf32>
    %6 = arith.truncf %5 : vector<16x96xf32> to vector<16x96xbf16>
    %c0_5 = arith.constant 0 : index
    %c0_6 = arith.constant 0 : index
    %7 = vector.load %arg5[%c0_5, %c0_6] : memref<16x96xbf16, #tpu.memory_space<vmem>>, vector<16x96xbf16>
    tpu.vector_store %arg5[%c0_5, %c0_6], %6 {strides = array<i32>} : memref<16x96xbf16, #tpu.memory_space<vmem>>, vector<16x96xbf16>,
    return
  }
  func.func @transform_0(%arg0: i32, %arg1: i32) -> (i32, i32) {
    %c0_i32 = arith.constant 0 : i32
    %c0_i32_0 = arith.constant 0 : i32
    return %arg1, %c0_i32 : i32, i32
  }
  func.func @transform_1(%arg0: i32, %arg1: i32) -> (i32, i32) {
    %c0_i32 = arith.constant 0 : i32
    %c0_i32_0 = arith.constant 0 : i32
    return %c0_i32, %arg0 : i32, i32
  }
  func.func @transform_2(%arg0: i32, %arg1: i32) -> (i32, i32) {
    %c0_i32 = arith.constant 0 : i32
    %c0_i32_0 = arith.constant 0 : i32
    return %c0_i32, %arg0 : i32, i32
  }
  func.func @transform_3(%arg0: i32, %arg1: i32) -> (i32, i32) {
    %c0_i32 = arith.constant 0 : i32
    return %arg1, %arg0 : i32, i32
  }
}

module attributes {stable_mosaic.version = 11 : i64} {
  func.func @_attention_kernel(%arg0: i32, %arg1: i32, %arg2: i32, %arg3: memref<1x1x8x16xbf16, #tpu.memory_space<vmem>>, %arg4: memref<1x1x8x16xbf16, #tpu.memory_space<vmem>>, %arg5: memref<1x1x8x16xbf16, #tpu.memory_space<vmem>>, %arg6: memref<1x8x8xf32, #tpu.memory_space<vmem>>, %arg7: memref<1x1x8x16xbf16, #tpu.memory_space<vmem>>) attributes {dimension_semantics = [#tpu.dimension_semantics<parallel>, #tpu.dimension_semantics<parallel>, #tpu.dimension_semantics<parallel>], iteration_bounds = array<i64: 2, 2, 1>, scalar_prefetch = 0 : i64, scratch_operands = 0 : i64, tpu.core_type = #tpu.core_type<tc>, window_params = [{transform_indices = @transform_0, window_bounds = array<i64: 1, 1, 8, 16>}, {transform_indices = @transform_1, window_bounds = array<i64: 1, 1, 8, 16>}, {transform_indices = @transform_2, window_bounds = array<i64: 1, 1, 8, 16>}, {transform_indices = @transform_3, window_bounds = array<i64: 1, 8, 8>}, {transform_indices = @transform_4, window_bounds = array<i64: 1, 1, 8, 16>}]} {
    %c0 = arith.constant 0 : index
    %c0_0 = arith.constant 0 : index
    %c0_1 = arith.constant 0 : index
    %c0_2 = arith.constant 0 : index
    %0 = vector.load %arg3[%c0, %c0_0, %c0_1, %c0_2] : memref<1x1x8x16xbf16, #tpu.memory_space<vmem>>, vector<1x1x8x16xbf16>
    %1 = vector.shape_cast %0 : vector<1x1x8x16xbf16> to vector<8x16xbf16>
    %c0_3 = arith.constant 0 : index
    %c0_4 = arith.constant 0 : index
    %c0_5 = arith.constant 0 : index
    %c0_6 = arith.constant 0 : index
    %2 = vector.load %arg4[%c0_3, %c0_4, %c0_5, %c0_6] : memref<1x1x8x16xbf16, #tpu.memory_space<vmem>>, vector<1x1x8x16xbf16>
    %3 = vector.shape_cast %2 : vector<1x1x8x16xbf16> to vector<8x16xbf16>
    %c0_7 = arith.constant 0 : index
    %c0_8 = arith.constant 0 : index
    %c0_9 = arith.constant 0 : index
    %c0_10 = arith.constant 0 : index
    %4 = vector.load %arg5[%c0_7, %c0_8, %c0_9, %c0_10] : memref<1x1x8x16xbf16, #tpu.memory_space<vmem>>, vector<1x1x8x16xbf16>
    %5 = vector.shape_cast %4 : vector<1x1x8x16xbf16> to vector<8x16xbf16>
    %cst = arith.constant dense<0.000000e+00> : vector<8x8xf32>
    %6 = tpu.matmul %1, %3, %cst {dimension_numbers = #tpu.dot_dimension_numbers<[1], [1], [0], [0], [0, 0, 1, 0], [], []>} : vector<8x16xbf16>, vector<8x16xbf16>, vector<8x8xf32> -> vector<8x8xf32>
    %c0_11 = arith.constant 0 : index
    %c0_12 = arith.constant 0 : index
    %c0_13 = arith.constant 0 : index
    %7 = vector.load %arg6[%c0_11, %c0_12, %c0_13] : memref<1x8x8xf32, #tpu.memory_space<vmem>>, vector<1x8x8xf32>
    %8 = vector.shape_cast %7 : vector<1x8x8xf32> to vector<8x8xf32>
    %9 = arith.addf %6, %8 : vector<8x8xf32>
    %cst_14 = arith.constant dense<0xFF800000> : vector<8xf32>
    %10 = vector.multi_reduction <maximumf>, %9, %cst_14 [1] : vector<8x8xf32> to vector<8xf32>
    %11 = vector.shape_cast %10 : vector<8xf32> to vector<8x1xf32>
    %12 = vector.broadcast %11 : vector<8x1xf32> to vector<8x8xf32>
    %13 = arith.subf %9, %12 : vector<8x8xf32>
    %14 = math.exp %13 : vector<8x8xf32>
    %cst_15 = arith.constant dense<0.000000e+00> : vector<8xf32>
    %15 = vector.multi_reduction <add>, %14, %cst_15 [1] : vector<8x8xf32> to vector<8xf32>
    %16 = vector.shape_cast %15 : vector<8xf32> to vector<8x1xf32>
    %17 = tpu.reciprocal %16 {approx = true} : vector<8x1xf32> -> vector<8x1xf32>
    %18 = vector.broadcast %17 : vector<8x1xf32> to vector<8x8xf32>
    %19 = arith.mulf %14, %18 : vector<8x8xf32>
    %20 = arith.truncf %19 : vector<8x8xf32> to vector<8x8xbf16>
    %cst_16 = arith.constant dense<0.000000e+00> : vector<8x16xf32>
    %21 = tpu.matmul %20, %5, %cst_16 {dimension_numbers = #tpu.dot_dimension_numbers<[1], [0], [0], [1], [0, 0, 1, 1], [], []>} : vector<8x8xbf16>, vector<8x16xbf16>, vector<8x16xf32> -> vector<8x16xf32>
    %22 = arith.truncf %21 : vector<8x16xf32> to vector<8x16xbf16>
    %c0_17 = arith.constant 0 : index
    %c0_18 = arith.constant 0 : index
    %c0_19 = arith.constant 0 : index
    %c0_20 = arith.constant 0 : index
    %23 = vector.load %arg7[%c0_17, %c0_18, %c0_19, %c0_20] : memref<1x1x8x16xbf16, #tpu.memory_space<vmem>>, vector<1x1x8x16xbf16>
    %24 = vector.shape_cast %23 : vector<1x1x8x16xbf16> to vector<8x16xbf16>
    %25 = vector.shape_cast %22 : vector<8x16xbf16> to vector<1x1x8x16xbf16>
    tpu.vector_store %arg7[%c0_17, %c0_18, %c0_19, %c0_20], %25 {strides = array<i32>} : memref<1x1x8x16xbf16, #tpu.memory_space<vmem>>, vector<1x1x8x16xbf16>,
    return
  }
  func.func @transform_0(%arg0: i32, %arg1: i32, %arg2: i32) -> (i32, i32, i32, i32) {
    %c0_i32 = arith.constant 0 : i32
    %c0_i32_0 = arith.constant 0 : i32
    return %arg0, %arg1, %arg2, %c0_i32 : i32, i32, i32, i32
  }
  func.func @transform_1(%arg0: i32, %arg1: i32, %arg2: i32) -> (i32, i32, i32, i32) {
    %c0_i32 = arith.constant 0 : i32
    %c0_i32_0 = arith.constant 0 : i32
    %c0_i32_1 = arith.constant 0 : i32
    return %arg0, %arg1, %c0_i32, %c0_i32_0 : i32, i32, i32, i32
  }
  func.func @transform_2(%arg0: i32, %arg1: i32, %arg2: i32) -> (i32, i32, i32, i32) {
    %c0_i32 = arith.constant 0 : i32
    %c0_i32_0 = arith.constant 0 : i32
    %c0_i32_1 = arith.constant 0 : i32
    return %arg0, %arg1, %c0_i32, %c0_i32_0 : i32, i32, i32, i32
  }
  func.func @transform_3(%arg0: i32, %arg1: i32, %arg2: i32) -> (i32, i32, i32) {
    %c0_i32 = arith.constant 0 : i32
    %c0_i32_0 = arith.constant 0 : i32
    return %arg0, %arg2, %c0_i32 : i32, i32, i32
  }
  func.func @transform_4(%arg0: i32, %arg1: i32, %arg2: i32) -> (i32, i32, i32, i32) {
    %c0_i32 = arith.constant 0 : i32
    %c0_i32_0 = arith.constant 0 : i32
    return %arg0, %arg1, %arg2, %c0_i32 : i32, i32, i32, i32
  }
}

module attributes {stable_mosaic.version = 11 : i64} {
  func.func @_out_proj_add_ln_kernel(%arg0: i32, %arg1: memref<16x32xbf16, #tpu.memory_space<vmem>>, %arg2: memref<32x32xbf16, #tpu.memory_space<vmem>>, %arg3: memref<1x32xf32, #tpu.memory_space<vmem>>, %arg4: memref<16x32xbf16, #tpu.memory_space<vmem>>, %arg5: memref<1x32xf32, #tpu.memory_space<vmem>>, %arg6: memref<1x32xf32, #tpu.memory_space<vmem>>, %arg7: memref<16x32xbf16, #tpu.memory_space<vmem>>) attributes {dimension_semantics = [#tpu.dimension_semantics<parallel>], iteration_bounds = array<i64: 1>, scalar_prefetch = 0 : i64, scratch_operands = 0 : i64, tpu.core_type = #tpu.core_type<tc>, window_params = [{transform_indices = @transform_0, window_bounds = array<i64: 16, 32>}, {pipeline_mode = #tpu.pipeline_mode<synchronous>, transform_indices = @transform_1, window_bounds = array<i64: 32, 32>}, {pipeline_mode = #tpu.pipeline_mode<synchronous>, transform_indices = @transform_2, window_bounds = array<i64: 1, 32>}, {transform_indices = @transform_3, window_bounds = array<i64: 16, 32>}, {pipeline_mode = #tpu.pipeline_mode<synchronous>, transform_indices = @transform_4, window_bounds = array<i64: 1, 32>}, {pipeline_mode = #tpu.pipeline_mode<synchronous>, transform_indices = @transform_5, window_bounds = array<i64: 1, 32>}, {transform_indices = @transform_6, window_bounds = array<i64: 16, 32>}]} {
    %c0 = arith.constant 0 : index
    %c0_0 = arith.constant 0 : index
    %0 = vector.load %arg1[%c0, %c0_0] : memref<16x32xbf16, #tpu.memory_space<vmem>>, vector<16x32xbf16>
    %c0_1 = arith.constant 0 : index
    %c0_2 = arith.constant 0 : index
    %1 = vector.load %arg2[%c0_1, %c0_2] : memref<32x32xbf16, #tpu.memory_space<vmem>>, vector<32x32xbf16>
    %cst = arith.constant dense<0.000000e+00> : vector<16x32xf32>
    %2 = tpu.matmul %0, %1, %cst {dimension_numbers = #tpu.dot_dimension_numbers<[1], [0], [0], [1], [0, 0, 1, 1], [], []>} : vector<16x32xbf16>, vector<32x32xbf16>, vector<16x32xf32> -> vector<16x32xf32>
    %c0_3 = arith.constant 0 : index
    %c0_4 = arith.constant 0 : index
    %3 = vector.load %arg3[%c0_3, %c0_4] : memref<1x32xf32, #tpu.memory_space<vmem>>, vector<1x32xf32>
    %4 = vector.broadcast %3 : vector<1x32xf32> to vector<16x32xf32>
    %5 = arith.addf %2, %4 : vector<16x32xf32>
    %c0_5 = arith.constant 0 : index
    %c0_6 = arith.constant 0 : index
    %6 = vector.load %arg4[%c0_5, %c0_6] : memref<16x32xbf16, #tpu.memory_space<vmem>>, vector<16x32xbf16>
    %7 = arith.extf %6 : vector<16x32xbf16> to vector<16x32xf32>
    %8 = arith.addf %7, %5 : vector<16x32xf32>
    %c0_7 = arith.constant 0 : index
    %c0_8 = arith.constant 0 : index
    %9 = vector.load %arg5[%c0_7, %c0_8] : memref<1x32xf32, #tpu.memory_space<vmem>>, vector<1x32xf32>
    %c0_9 = arith.constant 0 : index
    %c0_10 = arith.constant 0 : index
    %10 = vector.load %arg6[%c0_9, %c0_10] : memref<1x32xf32, #tpu.memory_space<vmem>>, vector<1x32xf32>
    %cst_11 = arith.constant dense<0.000000e+00> : vector<16xf32>
    %11 = vector.multi_reduction <add>, %8, %cst_11 [1] : vector<16x32xf32> to vector<16xf32>
    %12 = vector.shape_cast %11 : vector<16xf32> to vector<16x1xf32>
    %cst_12 = arith.constant 3.200000e+01 : f32
    %13 = vector.broadcast %cst_12 : f32 to vector<16x1xf32>
    %14 = arith.divf %12, %13 : vector<16x1xf32>
    %15 = vector.broadcast %14 : vector<16x1xf32> to vector<16x32xf32>
    %16 = arith.subf %8, %15 : vector<16x32xf32>
    %17 = arith.mulf %16, %16 : vector<16x32xf32>
    %cst_13 = arith.constant dense<0.000000e+00> : vector<16xf32>
    %18 = vector.multi_reduction <add>, %17, %cst_13 [1] : vector<16x32xf32> to vector<16xf32>
    %19 = vector.shape_cast %18 : vector<16xf32> to vector<16x1xf32>
    %cst_14 = arith.constant 3.200000e+01 : f32
    %20 = vector.broadcast %cst_14 : f32 to vector<16x1xf32>
    %21 = arith.divf %19, %20 : vector<16x1xf32>
    %22 = vector.broadcast %14 : vector<16x1xf32> to vector<16x32xf32>
    %23 = arith.subf %8, %22 : vector<16x32xf32>
    %cst_15 = arith.constant 9.99999974E-6 : f32
    %24 = vector.broadcast %cst_15 : f32 to vector<16x1xf32>
    %25 = arith.addf %21, %24 : vector<16x1xf32>
    %26 = math.rsqrt %25 : vector<16x1xf32>
    %27 = vector.broadcast %26 : vector<16x1xf32> to vector<16x32xf32>
    %28 = arith.mulf %23, %27 : vector<16x32xf32>
    %29 = vector.broadcast %9 : vector<1x32xf32> to vector<16x32xf32>
    %30 = arith.mulf %28, %29 : vector<16x32xf32>
    %31 = vector.broadcast %10 : vector<1x32xf32> to vector<16x32xf32>
    %32 = arith.addf %30, %31 : vector<16x32xf32>
    %33 = arith.truncf %32 : vector<16x32xf32> to vector<16x32xbf16>
    %c0_16 = arith.constant 0 : index
    %c0_17 = arith.constant 0 : index
    %34 = vector.load %arg7[%c0_16, %c0_17] : memref<16x32xbf16, #tpu.memory_space<vmem>>, vector<16x32xbf16>
    tpu.vector_store %arg7[%c0_16, %c0_17], %33 {strides = array<i32>} : memref<16x32xbf16, #tpu.memory_space<vmem>>, vector<16x32xbf16>,
    return
  }
  func.func @transform_0(%arg0: i32) -> (i32, i32) {
    %c0_i32 = arith.constant 0 : i32
    %c0_i32_0 = arith.constant 0 : i32
    return %arg0, %c0_i32 : i32, i32
  }
  func.func @transform_1(%arg0: i32) -> (i32, i32) {
    %c0_i32 = arith.constant 0 : i32
    %c0_i32_0 = arith.constant 0 : i32
    %c0_i32_1 = arith.constant 0 : i32
    return %c0_i32, %c0_i32_0 : i32, i32
  }
  func.func @transform_2(%arg0: i32) -> (i32, i32) {
    %c0_i32 = arith.constant 0 : i32
    %c0_i32_0 = arith.constant 0 : i32
    %c0_i32_1 = arith.constant 0 : i32
    return %c0_i32, %c0_i32_0 : i32, i32
  }
  func.func @transform_3(%arg0: i32) -> (i32, i32) {
    %c0_i32 = arith.constant 0 : i32
    %c0_i32_0 = arith.constant 0 : i32
    return %arg0, %c0_i32 : i32, i32
  }
  func.func @transform_4(%arg0: i32) -> (i32, i32) {
    %c0_i32 = arith.constant 0 : i32
    %c0_i32_0 = arith.constant 0 : i32
    %c0_i32_1 = arith.constant 0 : i32
    return %c0_i32, %c0_i32_0 : i32, i32
  }
  func.func @transform_5(%arg0: i32) -> (i32, i32) {
    %c0_i32 = arith.constant 0 : i32
    %c0_i32_0 = arith.constant 0 : i32
    %c0_i32_1 = arith.constant 0 : i32
    return %c0_i32, %c0_i32_0 : i32, i32
  }
  func.func @transform_6(%arg0: i32) -> (i32, i32) {
    %c0_i32 = arith.constant 0 : i32
    %c0_i32_0 = arith.constant 0 : i32
    return %arg0, %c0_i32 : i32, i32
  }
}

module attributes {stable_mosaic.version = 11 : i64} {
  func.func @_linear_kernel(%arg0: i32, %arg1: i32, %arg2: memref<16x32xbf16, #tpu.memory_space<vmem>>, %arg3: memref<32x32xbf16, #tpu.memory_space<vmem>>, %arg4: memref<1x32xf32, #tpu.memory_space<vmem>>, %arg5: memref<16x32xbf16, #tpu.memory_space<vmem>>) attributes {dimension_semantics = [#tpu.dimension_semantics<parallel>, #tpu.dimension_semantics<parallel>], iteration_bounds = array<i64: 1, 1>, scalar_prefetch = 0 : i64, scratch_operands = 0 : i64, tpu.core_type = #tpu.core_type<tc>, window_params = [{transform_indices = @transform_0, window_bounds = array<i64: 16, 32>}, {transform_indices = @transform_1, window_bounds = array<i64: 32, 32>}, {transform_indices = @transform_2, window_bounds = array<i64: 1, 32>}, {transform_indices = @transform_3, window_bounds = array<i64: 16, 32>}]} {
    %c0 = arith.constant 0 : index
    %c0_0 = arith.constant 0 : index
    %0 = vector.load %arg2[%c0, %c0_0] : memref<16x32xbf16, #tpu.memory_space<vmem>>, vector<16x32xbf16>
    %c0_1 = arith.constant 0 : index
    %c0_2 = arith.constant 0 : index
    %1 = vector.load %arg3[%c0_1, %c0_2] : memref<32x32xbf16, #tpu.memory_space<vmem>>, vector<32x32xbf16>
    %cst = arith.constant dense<0.000000e+00> : vector<16x32xf32>
    %2 = tpu.matmul %0, %1, %cst {dimension_numbers = #tpu.dot_dimension_numbers<[1], [0], [0], [1], [0, 0, 1, 1], [], []>} : vector<16x32xbf16>, vector<32x32xbf16>, vector<16x32xf32> -> vector<16x32xf32>
    %c0_3 = arith.constant 0 : index
    %c0_4 = arith.constant 0 : index
    %3 = vector.load %arg4[%c0_3, %c0_4] : memref<1x32xf32, #tpu.memory_space<vmem>>, vector<1x32xf32>
    %4 = vector.broadcast %3 : vector<1x32xf32> to vector<16x32xf32>
    %5 = arith.addf %2, %4 : vector<16x32xf32>
    %6 = arith.truncf %5 : vector<16x32xf32> to vector<16x32xbf16>
    %c0_5 = arith.constant 0 : index
    %c0_6 = arith.constant 0 : index
    %7 = vector.load %arg5[%c0_5, %c0_6] : memref<16x32xbf16, #tpu.memory_space<vmem>>, vector<16x32xbf16>
    tpu.vector_store %arg5[%c0_5, %c0_6], %6 {strides = array<i32>} : memref<16x32xbf16, #tpu.memory_space<vmem>>, vector<16x32xbf16>,
    return
  }
  func.func @transform_0(%arg0: i32, %arg1: i32) -> (i32, i32) {
    %c0_i32 = arith.constant 0 : i32
    %c0_i32_0 = arith.constant 0 : i32
    return %arg1, %c0_i32 : i32, i32
  }
  func.func @transform_1(%arg0: i32, %arg1: i32) -> (i32, i32) {
    %c0_i32 = arith.constant 0 : i32
    %c0_i32_0 = arith.constant 0 : i32
    return %c0_i32, %arg0 : i32, i32
  }
  func.func @transform_2(%arg0: i32, %arg1: i32) -> (i32, i32) {
    %c0_i32 = arith.constant 0 : i32
    %c0_i32_0 = arith.constant 0 : i32
    return %c0_i32, %arg0 : i32, i32
  }
  func.func @transform_3(%arg0: i32, %arg1: i32) -> (i32, i32) {
    %c0_i32 = arith.constant 0 : i32
    return %arg1, %arg0 : i32, i32
  }
}

module attributes {stable_mosaic.version = 11 : i64} {
  func.func @_linear_kernel(%arg0: i32, %arg1: i32, %arg2: memref<16x32xbf16, #tpu.memory_space<vmem>>, %arg3: memref<32x64xbf16, #tpu.memory_space<vmem>>, %arg4: memref<1x64xf32, #tpu.memory_space<vmem>>, %arg5: memref<16x64xbf16, #tpu.memory_space<vmem>>) attributes {dimension_semantics = [#tpu.dimension_semantics<parallel>, #tpu.dimension_semantics<parallel>], iteration_bounds = array<i64: 1, 1>, scalar_prefetch = 0 : i64, scratch_operands = 0 : i64, tpu.core_type = #tpu.core_type<tc>, window_params = [{transform_indices = @transform_0, window_bounds = array<i64: 16, 32>}, {transform_indices = @transform_1, window_bounds = array<i64: 32, 64>}, {transform_indices = @transform_2, window_bounds = array<i64: 1, 64>}, {transform_indices = @transform_3, window_bounds = array<i64: 16, 64>}]} {
    %c0 = arith.constant 0 : index
    %c0_0 = arith.constant 0 : index
    %0 = vector.load %arg2[%c0, %c0_0] : memref<16x32xbf16, #tpu.memory_space<vmem>>, vector<16x32xbf16>
    %c0_1 = arith.constant 0 : index
    %c0_2 = arith.constant 0 : index
    %1 = vector.load %arg3[%c0_1, %c0_2] : memref<32x64xbf16, #tpu.memory_space<vmem>>, vector<32x64xbf16>
    %cst = arith.constant dense<0.000000e+00> : vector<16x64xf32>
    %2 = tpu.matmul %0, %1, %cst {dimension_numbers = #tpu.dot_dimension_numbers<[1], [0], [0], [1], [0, 0, 1, 1], [], []>} : vector<16x32xbf16>, vector<32x64xbf16>, vector<16x64xf32> -> vector<16x64xf32>
    %c0_3 = arith.constant 0 : index
    %c0_4 = arith.constant 0 : index
    %3 = vector.load %arg4[%c0_3, %c0_4] : memref<1x64xf32, #tpu.memory_space<vmem>>, vector<1x64xf32>
    %4 = vector.broadcast %3 : vector<1x64xf32> to vector<16x64xf32>
    %5 = arith.addf %2, %4 : vector<16x64xf32>
    %6 = arith.truncf %5 : vector<16x64xf32> to vector<16x64xbf16>
    %c0_5 = arith.constant 0 : index
    %c0_6 = arith.constant 0 : index
    %7 = vector.load %arg5[%c0_5, %c0_6] : memref<16x64xbf16, #tpu.memory_space<vmem>>, vector<16x64xbf16>
    tpu.vector_store %arg5[%c0_5, %c0_6], %6 {strides = array<i32>} : memref<16x64xbf16, #tpu.memory_space<vmem>>, vector<16x64xbf16>,
    return
  }
  func.func @transform_0(%arg0: i32, %arg1: i32) -> (i32, i32) {
    %c0_i32 = arith.constant 0 : i32
    %c0_i32_0 = arith.constant 0 : i32
    return %arg1, %c0_i32 : i32, i32
  }
  func.func @transform_1(%arg0: i32, %arg1: i32) -> (i32, i32) {
    %c0_i32 = arith.constant 0 : i32
    %c0_i32_0 = arith.constant 0 : i32
    return %c0_i32, %arg0 : i32, i32
  }
  func.func @transform_2(%arg0: i32, %arg1: i32) -> (i32, i32) {
    %c0_i32 = arith.constant 0 : i32
    %c0_i32_0 = arith.constant 0 : i32
    return %c0_i32, %arg0 : i32, i32
  }
  func.func @transform_3(%arg0: i32, %arg1: i32) -> (i32, i32) {
    %c0_i32 = arith.constant 0 : i32
    return %arg1, %arg0 : i32, i32
  }
}

module attributes {stable_mosaic.version = 11 : i64} {
  func.func @_ffn_add_ln_kernel(%arg0: i32, %arg1: memref<16x32xbf16, #tpu.memory_space<vmem>>, %arg2: memref<32x64xbf16, #tpu.memory_space<vmem>>, %arg3: memref<1x64xf32, #tpu.memory_space<vmem>>, %arg4: memref<64x32xbf16, #tpu.memory_space<vmem>>, %arg5: memref<1x32xf32, #tpu.memory_space<vmem>>, %arg6: memref<1x32xf32, #tpu.memory_space<vmem>>, %arg7: memref<1x32xf32, #tpu.memory_space<vmem>>, %arg8: memref<16x32xbf16, #tpu.memory_space<vmem>>) attributes {dimension_semantics = [#tpu.dimension_semantics<parallel>], iteration_bounds = array<i64: 1>, scalar_prefetch = 0 : i64, scratch_operands = 0 : i64, tpu.core_type = #tpu.core_type<tc>, window_params = [{transform_indices = @transform_0, window_bounds = array<i64: 16, 32>}, {pipeline_mode = #tpu.pipeline_mode<synchronous>, transform_indices = @transform_1, window_bounds = array<i64: 32, 64>}, {pipeline_mode = #tpu.pipeline_mode<synchronous>, transform_indices = @transform_2, window_bounds = array<i64: 1, 64>}, {pipeline_mode = #tpu.pipeline_mode<synchronous>, transform_indices = @transform_3, window_bounds = array<i64: 64, 32>}, {pipeline_mode = #tpu.pipeline_mode<synchronous>, transform_indices = @transform_4, window_bounds = array<i64: 1, 32>}, {pipeline_mode = #tpu.pipeline_mode<synchronous>, transform_indices = @transform_5, window_bounds = array<i64: 1, 32>}, {pipeline_mode = #tpu.pipeline_mode<synchronous>, transform_indices = @transform_6, window_bounds = array<i64: 1, 32>}, {transform_indices = @transform_7, window_bounds = array<i64: 16, 32>}]} {
    %c0 = arith.constant 0 : index
    %c0_0 = arith.constant 0 : index
    %0 = vector.load %arg1[%c0, %c0_0] : memref<16x32xbf16, #tpu.memory_space<vmem>>, vector<16x32xbf16>
    %c0_1 = arith.constant 0 : index
    %c0_2 = arith.constant 0 : index
    %1 = vector.load %arg2[%c0_1, %c0_2] : memref<32x64xbf16, #tpu.memory_space<vmem>>, vector<32x64xbf16>
    %cst = arith.constant dense<0.000000e+00> : vector<16x64xf32>
    %2 = tpu.matmul %0, %1, %cst {dimension_numbers = #tpu.dot_dimension_numbers<[1], [0], [0], [1], [0, 0, 1, 1], [], []>} : vector<16x32xbf16>, vector<32x64xbf16>, vector<16x64xf32> -> vector<16x64xf32>
    %c0_3 = arith.constant 0 : index
    %c0_4 = arith.constant 0 : index
    %3 = vector.load %arg3[%c0_3, %c0_4] : memref<1x64xf32, #tpu.memory_space<vmem>>, vector<1x64xf32>
    %4 = vector.broadcast %3 : vector<1x64xf32> to vector<16x64xf32>
    %5 = arith.addf %2, %4 : vector<16x64xf32>
    %cst_5 = arith.constant 0.000000e+00 : f32
    %6 = vector.broadcast %cst_5 : f32 to vector<16x64xf32>
    %7 = arith.maximumf %5, %6 : vector<16x64xf32>
    %8 = arith.truncf %7 : vector<16x64xf32> to vector<16x64xbf16>
    %c0_6 = arith.constant 0 : index
    %c0_7 = arith.constant 0 : index
    %9 = vector.load %arg4[%c0_6, %c0_7] : memref<64x32xbf16, #tpu.memory_space<vmem>>, vector<64x32xbf16>
    %cst_8 = arith.constant dense<0.000000e+00> : vector<16x32xf32>
    %10 = tpu.matmul %8, %9, %cst_8 {dimension_numbers = #tpu.dot_dimension_numbers<[1], [0], [0], [1], [0, 0, 1, 1], [], []>} : vector<16x64xbf16>, vector<64x32xbf16>, vector<16x32xf32> -> vector<16x32xf32>
    %c0_9 = arith.constant 0 : index
    %c0_10 = arith.constant 0 : index
    %11 = vector.load %arg5[%c0_9, %c0_10] : memref<1x32xf32, #tpu.memory_space<vmem>>, vector<1x32xf32>
    %12 = vector.broadcast %11 : vector<1x32xf32> to vector<16x32xf32>
    %13 = arith.addf %10, %12 : vector<16x32xf32>
    %14 = arith.extf %0 : vector<16x32xbf16> to vector<16x32xf32>
    %15 = arith.addf %14, %13 : vector<16x32xf32>
    %c0_11 = arith.constant 0 : index
    %c0_12 = arith.constant 0 : index
    %16 = vector.load %arg6[%c0_11, %c0_12] : memref<1x32xf32, #tpu.memory_space<vmem>>, vector<1x32xf32>
    %c0_13 = arith.constant 0 : index
    %c0_14 = arith.constant 0 : index
    %17 = vector.load %arg7[%c0_13, %c0_14] : memref<1x32xf32, #tpu.memory_space<vmem>>, vector<1x32xf32>
    %cst_15 = arith.constant dense<0.000000e+00> : vector<16xf32>
    %18 = vector.multi_reduction <add>, %15, %cst_15 [1] : vector<16x32xf32> to vector<16xf32>
    %19 = vector.shape_cast %18 : vector<16xf32> to vector<16x1xf32>
    %cst_16 = arith.constant 3.200000e+01 : f32
    %20 = vector.broadcast %cst_16 : f32 to vector<16x1xf32>
    %21 = arith.divf %19, %20 : vector<16x1xf32>
    %22 = vector.broadcast %21 : vector<16x1xf32> to vector<16x32xf32>
    %23 = arith.subf %15, %22 : vector<16x32xf32>
    %24 = arith.mulf %23, %23 : vector<16x32xf32>
    %cst_17 = arith.constant dense<0.000000e+00> : vector<16xf32>
    %25 = vector.multi_reduction <add>, %24, %cst_17 [1] : vector<16x32xf32> to vector<16xf32>
    %26 = vector.shape_cast %25 : vector<16xf32> to vector<16x1xf32>
    %cst_18 = arith.constant 3.200000e+01 : f32
    %27 = vector.broadcast %cst_18 : f32 to vector<16x1xf32>
    %28 = arith.divf %26, %27 : vector<16x1xf32>
    %29 = vector.broadcast %21 : vector<16x1xf32> to vector<16x32xf32>
    %30 = arith.subf %15, %29 : vector<16x32xf32>
    %cst_19 = arith.constant 9.99999974E-6 : f32
    %31 = vector.broadcast %cst_19 : f32 to vector<16x1xf32>
    %32 = arith.addf %28, %31 : vector<16x1xf32>
    %33 = math.rsqrt %32 : vector<16x1xf32>
    %34 = vector.broadcast %33 : vector<16x1xf32> to vector<16x32xf32>
    %35 = arith.mulf %30, %34 : vector<16x32xf32>
    %36 = vector.broadcast %16 : vector<1x32xf32> to vector<16x32xf32>
    %37 = arith.mulf %35, %36 : vector<16x32xf32>
    %38 = vector.broadcast %17 : vector<1x32xf32> to vector<16x32xf32>
    %39 = arith.addf %37, %38 : vector<16x32xf32>
    %40 = arith.truncf %39 : vector<16x32xf32> to vector<16x32xbf16>
    %c0_20 = arith.constant 0 : index
    %c0_21 = arith.constant 0 : index
    %41 = vector.load %arg8[%c0_20, %c0_21] : memref<16x32xbf16, #tpu.memory_space<vmem>>, vector<16x32xbf16>
    tpu.vector_store %arg8[%c0_20, %c0_21], %40 {strides = array<i32>} : memref<16x32xbf16, #tpu.memory_space<vmem>>, vector<16x32xbf16>,
    return
  }
  func.func @transform_0(%arg0: i32) -> (i32, i32) {
    %c0_i32 = arith.constant 0 : i32
    %c0_i32_0 = arith.constant 0 : i32
    return %arg0, %c0_i32 : i32, i32
  }
  func.func @transform_1(%arg0: i32) -> (i32, i32) {
    %c0_i32 = arith.constant 0 : i32
    %c0_i32_0 = arith.constant 0 : i32
    %c0_i32_1 = arith.constant 0 : i32
    return %c0_i32, %c0_i32_0 : i32, i32
  }
  func.func @transform_2(%arg0: i32) -> (i32, i32) {
    %c0_i32 = arith.constant 0 : i32
    %c0_i32_0 = arith.constant 0 : i32
    %c0_i32_1 = arith.constant 0 : i32
    return %c0_i32, %c0_i32_0 : i32, i32
  }
  func.func @transform_3(%arg0: i32) -> (i32, i32) {
    %c0_i32 = arith.constant 0 : i32
    %c0_i32_0 = arith.constant 0 : i32
    %c0_i32_1 = arith.constant 0 : i32
    return %c0_i32, %c0_i32_0 : i32, i32
  }
  func.func @transform_4(%arg0: i32) -> (i32, i32) {
    %c0_i32 = arith.constant 0 : i32
    %c0_i32_0 = arith.constant 0 : i32
    %c0_i32_1 = arith.constant 0 : i32
    return %c0_i32, %c0_i32_0 : i32, i32
  }
  func.func @transform_5(%arg0: i32) -> (i32, i32) {
    %c0_i32 = arith.constant 0 : i32
    %c0_i32_0 = arith.constant 0 : i32
    %c0_i32_1 = arith.constant 0 : i32
    return %c0_i32, %c0_i32_0 : i32, i32
  }
  func.func @transform_6(%arg0: i32) -> (i32, i32) {
    %c0_i32 = arith.constant 0 : i32
    %c0_i32_0 = arith.constant 0 : i32
    %c0_i32_1 = arith.constant 0 : i32
    return %c0_i32, %c0_i32_0 : i32, i32
  }
  func.func @transform_7(%arg0: i32) -> (i32, i32) {
    %c0_i32 = arith.constant 0 : i32
    %c0_i32_0 = arith.constant 0 : i32
    return %arg0, %c0_i32 : i32, i32
  }
}

module attributes {stable_mosaic.version = 11 : i64} {
  func.func @_linear_kernel(%arg0: i32, %arg1: i32, %arg2: memref<16x32xbf16, #tpu.memory_space<vmem>>, %arg3: memref<32x16xbf16, #tpu.memory_space<vmem>>, %arg4: memref<1x16xf32, #tpu.memory_space<vmem>>, %arg5: memref<16x16xf32, #tpu.memory_space<vmem>>) attributes {dimension_semantics = [#tpu.dimension_semantics<parallel>, #tpu.dimension_semantics<parallel>], iteration_bounds = array<i64: 1, 1>, scalar_prefetch = 0 : i64, scratch_operands = 0 : i64, tpu.core_type = #tpu.core_type<tc>, window_params = [{transform_indices = @transform_0, window_bounds = array<i64: 16, 32>}, {transform_indices = @transform_1, window_bounds = array<i64: 32, 16>}, {transform_indices = @transform_2, window_bounds = array<i64: 1, 16>}, {transform_indices = @transform_3, window_bounds = array<i64: 16, 16>}]} {
    %c0 = arith.constant 0 : index
    %c0_0 = arith.constant 0 : index
    %0 = vector.load %arg2[%c0, %c0_0] : memref<16x32xbf16, #tpu.memory_space<vmem>>, vector<16x32xbf16>
    %c0_1 = arith.constant 0 : index
    %c0_2 = arith.constant 0 : index
    %1 = vector.load %arg3[%c0_1, %c0_2] : memref<32x16xbf16, #tpu.memory_space<vmem>>, vector<32x16xbf16>
    %cst = arith.constant dense<0.000000e+00> : vector<16x16xf32>
    %2 = tpu.matmul %0, %1, %cst {dimension_numbers = #tpu.dot_dimension_numbers<[1], [0], [0], [1], [0, 0, 1, 1], [], []>} : vector<16x32xbf16>, vector<32x16xbf16>, vector<16x16xf32> -> vector<16x16xf32>
    %c0_3 = arith.constant 0 : index
    %c0_4 = arith.constant 0 : index
    %3 = vector.load %arg4[%c0_3, %c0_4] : memref<1x16xf32, #tpu.memory_space<vmem>>, vector<1x16xf32>
    %4 = vector.broadcast %3 : vector<1x16xf32> to vector<16x16xf32>
    %5 = arith.addf %2, %4 : vector<16x16xf32>
    %c0_5 = arith.constant 0 : index
    %c0_6 = arith.constant 0 : index
    %6 = vector.load %arg5[%c0_5, %c0_6] : memref<16x16xf32, #tpu.memory_space<vmem>>, vector<16x16xf32>
    tpu.vector_store %arg5[%c0_5, %c0_6], %5 {strides = array<i32>} : memref<16x16xf32, #tpu.memory_space<vmem>>, vector<16x16xf32>,
    return
  }
  func.func @transform_0(%arg0: i32, %arg1: i32) -> (i32, i32) {
    %c0_i32 = arith.constant 0 : i32
    %c0_i32_0 = arith.constant 0 : i32
    return %arg1, %c0_i32 : i32, i32
  }
  func.func @transform_1(%arg0: i32, %arg1: i32) -> (i32, i32) {
    %c0_i32 = arith.constant 0 : i32
    %c0_i32_0 = arith.constant 0 : i32
    return %c0_i32, %arg0 : i32, i32
  }
  func.func @transform_2(%arg0: i32, %arg1: i32) -> (i32, i32) {
    %c0_i32 = arith.constant 0 : i32
    %c0_i32_0 = arith.constant 0 : i32
    return %c0_i32, %arg0 : i32, i32
  }
  func.func @transform_3(%arg0: i32, %arg1: i32) -> (i32, i32) {
    %c0_i32 = arith.constant 0 : i32
    return %arg1, %arg0 : i32, i32
  }
}

</mosaic_0001>

<bundles_post_ra>
// kernel: encoder_decoder_forward.33
= control target key start
LH: loop header
LB: loop body
LE: loop exit
PB: predicated region body
PF: predicated region fallthrough
CT: control target
= control target key end

     0   :  { %v130_v0 = vmov 0.0   ;;  %vm131_vm0 = vmmov 0   ;;  %vm45_vm1 = vcmask 261120   ;;  %vm98_vm2 = vcmask 781312   ;;  %s170_s1 = inlined_call_operand.vmem [shape: bf16[32,96], index: 1, kind: input, shape index: {}]   ;;  %s171_s0 = inlined_call_operand.vmem [shape: bf16[16,32], index: 0, kind: input, shape index: {}]   ;;  %s172_s2 = inlined_call_operand.vmem [shape: f32[1,96], index: 2, kind: input, shape index: {}]   ;;  %s173_s3 = inlined_call_operand.vmem [shape: bf16[16,96], index: 3, kind: output, shape index: {}]  }
   0x1   :  { %117 = vmatprep.subr.bf16.mxu0 %v130_v0  ;;  %v127_v1 = vld [vmem:[%s170_s1 + $0x8] sm:$0xff]   ;;  %121 = vmatprep.mubr.msk.bf16.mxu0 %vm131_vm0, %v130_v0  ;;  %v128_v2 = vld [vmem:[%s170_s1] sm:$0xff]  }
   0x2   :  { %118 = vmatpush3.bf16.msra.mxu0 %v127_v1  ;;  %v129_v3 = vld [vmem:[%s171_s0] sm:$0xff]  }
   0x3   :  { %119 = vmatprep.subr.bf16.mxu0 %v130_v0  ;;  %v105_v4 = vld [vmem:[%s172_s2] ss:$0 sm:$0xff] }
   0x6   :  { %120 = vmatpush3.bf16.msra.mxu0 %v128_v2 }
   0x9   :  { %122 = vmatmul.mubr.msk.bf16.vlgmr.msra.gmra.mxu0 %vm45_vm1, %v129_v3 }
  0xc9   :  { %v83_v5 = vpop.f32.mrf.mxu0 }
  0xca   :  { %v84_v6 = vadd.f32 %v105_v4, %v83_v5 }
  0xcb   :  { %v123_v7 = vpop.f32.mrf.mxu0 }
  0xcc   :  { %v112_v8 = vpack.c.bf16 %v84_v6, %v84_v6 }
  0xcd   :  { %v86_v9 = vpop.f32.mrf.mxu0 }
  0xce   :  { %99 = vst.msk [vmem:[%s173_s3] sm:$0xf] %vm98_vm2, %v112_v8  ;;  %v87_v10 = vadd.f32 %v105_v4, %v86_v9 }
  0xcf   :  { %v124_v11 = vpop.f32.mrf.mxu0 }
  0xd0   :  { %v113_v12 = vpack.c.bf16 %v87_v10, %v87_v10 }
  0xd2   :  { %100 = vst.msk [vmem:[%s173_s3 + $0x4] sm:$0xf] %vm98_vm2, %v113_v12 }

// kernel: encoder_decoder_forward.34
= control target key start
LH: loop header
LB: loop body
LE: loop exit
PB: predicated region body
PF: predicated region fallthrough
CT: control target
= control target key end

     0   :  { %s760_s15 = smov 0   ;;  %s762_s16 = smov 0   ;;  %s829_s0 = inlined_call_operand.vmem [shape: bf16[2,2,8,16], index: 0, kind: input, shape index: {}]   ;;  %s830_s1 = inlined_call_operand.vmem [shape: bf16[2,2,8,16], index: 1, kind: input, shape index: {}]   ;;  %s831_s2 = inlined_call_operand.vmem [shape: bf16[2,2,8,16], index: 2, kind: input, shape index: {}]   ;;  %s832_s3 = inlined_call_operand.vmem [shape: f32[2,8,8], index: 3, kind: input, shape index: {}]   ;;  %s833_s4 = inlined_call_operand.vmem [shape: bf16[2,2,8,16], index: 4, kind: output, shape index: {}]  }
   0x1   :  { %s764_s17 = smov 0   ;;  %s766_s18 = smov 0  }
   0x2   :  { %s768_s19 = smov 0  }
   0x3 LB: > { %s29_s20 = sadd.s32 1, %s723_s17  ;;  %s33_s21 = sadd.s32 1, %s727_s18  ;;  %s731_s19 = sphi %s768_s19, %s14_s19   ;;  %s727_s18 = sphi %s766_s18, %s837_s18   ;;  %s723_s17 = sphi %s764_s17, %s836_s17   ;;  %s719_s16 = sphi %s762_s16, %s835_s16   ;;  %s715_s15 = sphi %s760_s15, %s834_s15  }
   0x4   : > { %p31_p0 = scmp.ge.s32.totalorder %s29_s20, 2  ;;  %p617_p1 = scmp.ge.s32.totalorder %s731_s19, 1 }
   0x5   : > { %p239_p2 = scmp.lt.s32.totalorder %s731_s19, 5 }
   0x6   : > { %s839_s20 = smov (%p31_p0, %s29_s20), 0  ;;  %s841_s21 = smov (!%p31_p0, %s33_s21), %s727_s18 }
   0x7   : > { %p240_p3 = pnand %p617_p1, %p239_p2  ;;  %p35_p4 = scmp.ge.s32.totalorder %s841_s21, 2 }
   0x8   : > { %p300_p5 = scmp.lt.s32.totalorder (!%p240_p3), %s719_s16, 1  ;;  %p302_p6 = scmp.lt.s32.totalorder (!%p240_p3), %s715_s15, 1 }
   0x9   : > { %s843_s21 = smov (%p35_p4, %s841_s21), 0  ;;  %243 = sbr.rel (%p240_p3) target bundleno = 736 (0x2e0), region = 36 }
   0xe   : > { %v733_v0 = vmov 0.0   ;;  %vm734_vm0 = vmmov 0   ;;  %s845_s16 = smov (!%p300_p5, %s719_s16), 1  ;;  %s847_s15 = smov (!%p302_p6, %s715_s15), 1  ;;  %vm350_vm1 = vcmask 130048   ;;  %vm397_vm2 = vcmask 64512  }
   0xf   : > { %635 = vmatprep.subr.bf16.mxu0 %v733_v0  ;;  %637 = vmatprep.mubr.msk.bf16.mxu0 %vm734_vm0, %v733_v0  ;;  %s618_s22 = sshll.u32 %s845_s16, 1  ;;  %s624_s5 = sshll.u32 %s845_s16, 3  ;;  %vm413_vm3 = vcmask 1043456   ;;  %vm458_vm4 = vcmask 125952  }
  0x10   : > { %641 = vmatprep.subr.bf16.mxu1 %v733_v0  ;;  %643 = vmatprep.mubr.msk.bf16.mxu1 %vm734_vm0, %v733_v0  ;;  %s308_s23 = sadd.s32 %s618_s22, %s847_s15  ;;  %s333_s8 = scalar_lea.vmem %s832_s3, %s624_s5 }
  0x11   : > { %s790_s24 = sshll.u32 %s308_s23, 2  ;;  %v349_v4 = vld [vmem:[%s333_s8] sm:$0xff] }
  0x12   : > { %s318_s27 = scalar_lea.vmem %s830_s1, %s790_s24  ;;  %s310_s30 = scalar_lea.vmem %s829_s0, %s790_s24 }
  0x13   : > { %v347_v1 = vld [vmem:[%s318_s27] sm:$0xf]  ;;  %s326_s11 = scalar_lea.vmem %s831_s2, %s790_s24  ;;  %s344_s14 = scalar_lea.vmem %s833_s4, %s790_s24 }
  0x14   : > { %v355_v2 = vsel %vm350_vm1, %v347_v1, 0  ;;  %v346_v3 = vld [vmem:[%s310_s30] sm:$0xf] }
  0x15   : > { %636 = vmatpush3.bf16.xpose.msra.mxu0 %v355_v2  ;;  %v348_v16 = vld [vmem:[%s326_s11] sm:$0xf] }
  0x16   : > { %v415_v17 = vsel %vm413_vm3, %v348_v16, 0 }
  0x17   : > { %642 = vmatpush3.bf16.msra.mxu1 %v415_v17 }
  0x1c   : > { %638 = vmatmul.mubr.msk.bf16.vlgmr.msra.gmra.mxu0 %vm350_vm1, %v346_v3 }
  0xdc   : > { %v391_v5 = vpop.f32.mrf.mxu0 }
  0xdd   : > { %v392_v6 = vadd.f32 %v391_v5, %v349_v4 }
  0xde   : > { %v639_v7 = vpop.f32.mrf.mxu0 }
  0xdf   : > { %v398_v8 = vsel %vm397_vm2, %v392_v6, -inf }
  0xe0   : > { %399 = vmax.xlane.f32.xlu0 %v398_v8  ;;  %v394_v9 = vpop.f32.mrf.mxu0 }
  0xe2   : > { %v640_v10 = vpop.f32.mrf.mxu0 }
 0x169   : > { %v400_v11 = vpop.xlane.xlu0 %399 }
 0x16a   : > { %v401_v12 = vsub.f32 %v392_v6, %v400_v11 }
 0x16c   : > { %v402_v13 = vmul.f32 1.442695, %v401_v12 }
 0x16e   : > { %689 = vpow2.f32 %v402_v13 }
 0x17b   : > { %v690_v14 = vpop.eup %689 }
 0x17c   : > { %v404_v15 = vsel %vm397_vm2, %v690_v14, 0.0 }
 0x17d   : > { %405 = vadd.xlane.f32.xlu0 %v404_v15 }
 0x206   : > { %v406_v18 = vpop.xlane.xlu0 %405 }
 0x207   : > { %691 = vrcp.f32 %v406_v18 }
 0x214   : > { %v692_v19 = vpop.eup %691 }
 0x215   : > { %v408_v20 = vmul.f32 %v692_v19, %v690_v14 }
 0x217   : > { %v409_v21 = vpack.c.bf16 %v408_v20, %v408_v20 }
 0x219   : > { %644 = vmatmul.mubr.msk.bf16.vlgmr.msra.gmra.mxu1 %vm397_vm2, %v409_v21 }
 0x2d9   : > { %v451_v22 = vpop.f32.mrf.mxu1 }
 0x2da   : > { %v457_v23 = vpack.c.bf16 %v451_v22, %v451_v22 }
 0x2db   : > { %v645_v24 = vpop.f32.mrf.mxu1 }
 0x2dc   : > { %459 = vst.msk [vmem:[%s344_s14] sm:$0xf] %vm458_vm4, %v457_v23 }
 0x2dd   : > { %v454_v25 = vpop.f32.mrf.mxu1 }
 0x2df   : > { %v646_v26 = vpop.f32.mrf.mxu1 }
 0x2e0 PF: > { %s14_s19 = sadd.s32 1, %s731_s19   ;;  %s834_s15 = smov %s723_s17 }
 0x2e1   : > { %p11_p7 = scmp.ge.s32.totalorder %s14_s19, 6   ;;  %s835_s16 = smov %s727_s18 }
 0x2e2   : > { %s836_s17 = smov %s839_s20  ;;  %s837_s18 = smov %s843_s21 }
 0x2e3   :  { %13 = sbr.rel (!%p11_p7) target bundleno = 3 (0x3), region = 75 }

// kernel: encoder_decoder_forward.36
= control target key start
LH: loop header
LB: loop body
LE: loop exit
PB: predicated region body
PF: predicated region fallthrough
CT: control target
= control target key end

     0   :  { %v130_v0 = vmov 0.0   ;;  %vm131_vm0 = vmmov 0   ;;  %vm45_vm1 = vcmask 261120   ;;  %vm98_vm2 = vcmask 257024   ;;  %s170_s1 = inlined_call_operand.vmem [shape: bf16[32,32], index: 1, kind: input, shape index: {}]   ;;  %s171_s0 = inlined_call_operand.vmem [shape: bf16[16,32], index: 0, kind: input, shape index: {}]   ;;  %s172_s2 = inlined_call_operand.vmem [shape: f32[1,32], index: 2, kind: input, shape index: {}]   ;;  %s173_s3 = inlined_call_operand.vmem [shape: bf16[16,32], index: 3, kind: output, shape index: {}]  }
   0x1   :  { %117 = vmatprep.subr.bf16.mxu0 %v130_v0  ;;  %v127_v1 = vld [vmem:[%s170_s1 + $0x8] sm:$0xff]   ;;  %121 = vmatprep.mubr.msk.bf16.mxu0 %vm131_vm0, %v130_v0  ;;  %v128_v2 = vld [vmem:[%s170_s1] sm:$0xff]  }
   0x2   :  { %118 = vmatpush3.bf16.msra.mxu0 %v127_v1  ;;  %v129_v3 = vld [vmem:[%s171_s0] sm:$0xff]  }
   0x3   :  { %119 = vmatprep.subr.bf16.mxu0 %v130_v0  ;;  %v105_v4 = vld [vmem:[%s172_s2] ss:$0 sm:$0xff] }
   0x6   :  { %120 = vmatpush3.bf16.msra.mxu0 %v128_v2 }
   0x9   :  { %122 = vmatmul.mubr.msk.bf16.vlgmr.msra.gmra.mxu0 %vm45_vm1, %v129_v3 }
  0xc9   :  { %v83_v5 = vpop.f32.mrf.mxu0 }
  0xca   :  { %v84_v6 = vadd.f32 %v105_v4, %v83_v5 }
  0xcb   :  { %v123_v7 = vpop.f32.mrf.mxu0 }
  0xcc   :  { %v112_v8 = vpack.c.bf16 %v84_v6, %v84_v6 }
  0xcd   :  { %v86_v9 = vpop.f32.mrf.mxu0 }
  0xce   :  { %99 = vst.msk [vmem:[%s173_s3] sm:$0xf] %vm98_vm2, %v112_v8  ;;  %v87_v10 = vadd.f32 %v105_v4, %v86_v9 }
  0xcf   :  { %v124_v11 = vpop.f32.mrf.mxu0 }
  0xd0   :  { %v113_v12 = vpack.c.bf16 %v87_v10, %v87_v10 }
  0xd2   :  { %100 = vst.msk [vmem:[%s173_s3 + $0x4] sm:$0xf] %vm98_vm2, %v113_v12 }

// kernel: encoder_decoder_forward.37
= control target key start
LH: loop header
LB: loop body
LE: loop exit
PB: predicated region body
PF: predicated region fallthrough
CT: control target
= control target key end

     0   :  { %v130_v0 = vmov 0.0   ;;  %vm131_vm0 = vmmov 0   ;;  %vm45_vm1 = vcmask 261120   ;;  %vm98_vm2 = vcmask 519168   ;;  %s170_s1 = inlined_call_operand.vmem [shape: bf16[32,64], index: 1, kind: input, shape index: {}]   ;;  %s171_s0 = inlined_call_operand.vmem [shape: bf16[16,32], index: 0, kind: input, shape index: {}]   ;;  %s172_s2 = inlined_call_operand.vmem [shape: f32[1,64], index: 2, kind: input, shape index: {}]   ;;  %s173_s3 = inlined_call_operand.vmem [shape: bf16[16,64], index: 3, kind: output, shape index: {}]  }
   0x1   :  { %117 = vmatprep.subr.bf16.mxu0 %v130_v0  ;;  %v127_v1 = vld [vmem:[%s170_s1 + $0x8] sm:$0xff]   ;;  %121 = vmatprep.mubr.msk.bf16.mxu0 %vm131_vm0, %v130_v0  ;;  %v128_v2 = vld [vmem:[%s170_s1] sm:$0xff]  }
   0x2   :  { %118 = vmatpush3.bf16.msra.mxu0 %v127_v1  ;;  %v129_v3 = vld [vmem:[%s171_s0] sm:$0xff]  }
   0x3   :  { %119 = vmatprep.subr.bf16.mxu0 %v130_v0  ;;  %v105_v4 = vld [vmem:[%s172_s2] ss:$0 sm:$0xff] }
   0x6   :  { %120 = vmatpush3.bf16.msra.mxu0 %v128_v2 }
   0x9   :  { %122 = vmatmul.mubr.msk.bf16.vlgmr.msra.gmra.mxu0 %vm45_vm1, %v129_v3 }
  0xc9   :  { %v83_v5 = vpop.f32.mrf.mxu0 }
  0xca   :  { %v84_v6 = vadd.f32 %v105_v4, %v83_v5 }
  0xcb   :  { %v123_v7 = vpop.f32.mrf.mxu0 }
  0xcc   :  { %v112_v8 = vpack.c.bf16 %v84_v6, %v84_v6 }
  0xcd   :  { %v86_v9 = vpop.f32.mrf.mxu0 }
  0xce   :  { %99 = vst.msk [vmem:[%s173_s3] sm:$0xf] %vm98_vm2, %v112_v8  ;;  %v87_v10 = vadd.f32 %v105_v4, %v86_v9 }
  0xcf   :  { %v124_v11 = vpop.f32.mrf.mxu0 }
  0xd0   :  { %v113_v12 = vpack.c.bf16 %v87_v10, %v87_v10 }
  0xd2   :  { %100 = vst.msk [vmem:[%s173_s3 + $0x4] sm:$0xf] %vm98_vm2, %v113_v12 }

// kernel: encoder_decoder_forward.35
= control target key start
LH: loop header
LB: loop body
LE: loop exit
PB: predicated region body
PF: predicated region fallthrough
CT: control target
= control target key end

     0   :  { %v200_v0 = vmov 0.0   ;;  %vm201_vm0 = vmmov 0   ;;  %vm54_vm1 = vcmask 261120   ;;  %vm158_vm2 = vcmask 257024   ;;  %s269_s1 = inlined_call_operand.vmem [shape: bf16[32,32], index: 1, kind: input, shape index: {}]   ;;  %s270_s0 = inlined_call_operand.vmem [shape: bf16[16,32], index: 0, kind: input, shape index: {}]   ;;  %s271_s3 = inlined_call_operand.vmem [shape: bf16[16,32], index: 3, kind: input, shape index: {}]   ;;  %s272_s2 = inlined_call_operand.vmem [shape: f32[1,32], index: 2, kind: input, shape index: {}]   ;;  %s273_s4 = inlined_call_operand.vmem [shape: f32[1,32], index: 4, kind: input, shape index: {}]   ;;  %s274_s5 = inlined_call_operand.vmem [shape: f32[1,32], index: 5, kind: input, shape index: {}]   ;;  %s275_s6 = inlined_call_operand.vmem [shape: bf16[16,32], index: 6, kind: output, shape index: {}]  }
   0x1   :  { %183 = vmatprep.subr.bf16.mxu0 %v200_v0  ;;  %v193_v1 = vld [vmem:[%s269_s1 + $0x8] sm:$0xff]   ;;  %187 = vmatprep.mubr.msk.bf16.mxu0 %vm201_vm0, %v200_v0  ;;  %v194_v2 = vld [vmem:[%s269_s1] sm:$0xff]  }
   0x2   :  { %184 = vmatpush3.bf16.msra.mxu0 %v193_v1  ;;  %v195_v3 = vld [vmem:[%s270_s0] sm:$0xff]  }
   0x3   :  { %185 = vmatprep.subr.bf16.mxu0 %v200_v0  ;;  %v177_v4 = vld [vmem:[%s271_s3] sm:$0xff]  }
   0x4   :  { %v165_v5 = vld [vmem:[%s272_s2] ss:$0 sm:$0xff]  ;;  %v178_v6 = vunpack.c.l.bf16 %v177_v4  ;;  %v179_v11 = vunpack.c.h.bf16 %v177_v4 }
   0x5   :  { %v170_v35 = vld [vmem:[%s273_s4] ss:$0 sm:$0xff] }
   0x6   :  { %186 = vmatpush3.bf16.msra.mxu0 %v194_v2  ;;  %v171_v37 = vld [vmem:[%s274_s5] ss:$0 sm:$0xff] }
   0x9   :  { %188 = vmatmul.mubr.msk.bf16.vlgmr.msra.gmra.mxu0 %vm54_vm1, %v195_v3 }
  0xc9   :  { %v92_v7 = vpop.f32.mrf.mxu0 }
  0xca   :  { %v93_v8 = vadd.f32 %v165_v5, %v92_v7 }
  0xcb   :  { %v189_v9 = vpop.f32.mrf.mxu0 }
  0xcc   :  { %v103_v10 = vadd.f32 %v178_v6, %v93_v8 }
  0xcd   :  { %v95_v12 = vpop.f32.mrf.mxu0 }
  0xce   :  { %v96_v13 = vadd.f32 %v165_v5, %v95_v12  ;;  %v107_v14 = vsel %vm54_vm1, %v103_v10, 0.0 }
  0xcf   :  { %108 = vadd.xlane.f32.xlu0 %v107_v14  ;;  %v190_v15 = vpop.f32.mrf.mxu0 }
  0xd0   :  { %v104_v16 = vadd.f32 %v179_v11, %v96_v13 }
  0xd2   :  { %v110_v17 = vsel %vm54_vm1, %v104_v16, 0.0 }
  0xd3   :  { %111 = vadd.xlane.f32.xlu0 %v110_v17 }
 0x158   :  { %v109_v18 = vpop.xlane.xlu0 %108 }
 0x159   :  { %v114_v19 = vmul.f32 0.03125, %v109_v18 }
 0x15b   :  { %v116_v20 = vsub.f32 %v103_v10, %v114_v19 }
 0x15c   :  { %v112_v21 = vpop.xlane.xlu0 %111 }
 0x15d   :  { %v115_v22 = vmul.f32 0.03125, %v112_v21  ;;  %v118_v23 = vmul.f32 %v116_v20, %v116_v20 }
 0x15f   :  { %v117_v24 = vsub.f32 %v104_v16, %v115_v22  ;;  %v120_v25 = vsel %vm54_vm1, %v118_v23, 0.0 }
 0x160   :  { %121 = vadd.xlane.f32.xlu1 %v120_v25 }
 0x161   :  { %v119_v26 = vmul.f32 %v117_v24, %v117_v24 }
 0x163   :  { %v123_v27 = vsel %vm54_vm1, %v119_v26, 0.0 }
 0x164   :  { %124 = vadd.xlane.f32.xlu1 %v123_v27 }
 0x1e9   :  { %v122_v28 = vpop.xlane.xlu1 %121 }
 0x1ea   :  { %v126_v29 = vmul.f32 0.03125, %v122_v28 }
 0x1ec   :  { %v128_v30 = vadd.f32 1e-05, %v126_v29 }
 0x1ed   :  { %v125_v31 = vpop.xlane.xlu1 %124 }
 0x1ee   :  { %196 = vrsqrt.f32 %v128_v30  ;;  %v127_v32 = vmul.f32 0.03125, %v125_v31 }
 0x1f0   :  { %v129_v33 = vadd.f32 1e-05, %v127_v32 }
 0x1f2   :  { %198 = vrsqrt.f32 %v129_v33 }
 0x1fb   :  { %v197_v34 = vpop.eup %196 }
 0x1fc   :  { %v132_v36 = vmul.f32 %v197_v34, %v116_v20 }
 0x1fe   :  { %v140_v38 = vmul.f32 %v170_v35, %v132_v36 }
 0x1ff   :  { %v199_v39 = vpop.eup %198 }
 0x200   :  { %v148_v40 = vadd.f32 %v171_v37, %v140_v38  ;;  %v133_v41 = vmul.f32 %v199_v39, %v117_v24 }
 0x202   :  { %v174_v42 = vpack.c.bf16 %v148_v40, %v148_v40  ;;  %v141_v43 = vmul.f32 %v170_v35, %v133_v41 }
 0x204   :  { %159 = vst.msk [vmem:[%s275_s6] sm:$0xf] %vm158_vm2, %v174_v42  ;;  %v149_v44 = vadd.f32 %v171_v37, %v141_v43 }
 0x206   :  { %v175_v45 = vpack.c.bf16 %v149_v44, %v149_v44 }
 0x208   :  { %160 = vst.msk [vmem:[%s275_s6 + $0x4] sm:$0xf] %vm158_vm2, %v175_v45 }

// kernel: encoder_decoder_forward.28
= control target key start
LH: loop header
LB: loop body
LE: loop exit
PB: predicated region body
PF: predicated region fallthrough
CT: control target
= control target key end

     0   :  { %v312_v0 = vmov 0.0   ;;  %vm313_vm0 = vmmov 0   ;;  %vm57_vm1 = vcmask 261120   ;;  %vm144_vm2 = vcmask 523264   ;;  %s398_s1 = inlined_call_operand.vmem [shape: bf16[32,64], index: 1, kind: input, shape index: {}]   ;;  %s399_s0 = inlined_call_operand.vmem [shape: bf16[16,32], index: 0, kind: input, shape index: {}]   ;;  %s400_s3 = inlined_call_operand.vmem [shape: bf16[64,32], index: 3, kind: input, shape index: {}]   ;;  %s401_s2 = inlined_call_operand.vmem [shape: f32[1,64], index: 2, kind: input, shape index: {}]   ;;  %s402_s4 = inlined_call_operand.vmem [shape: f32[1,32], index: 4, kind: input, shape index: {}]   ;;  %s403_s5 = inlined_call_operand.vmem [shape: f32[1,32], index: 5, kind: input, shape index: {}]   ;;  %s404_s6 = inlined_call_operand.vmem [shape: f32[1,32], index: 6, kind: input, shape index: {}]   ;;  %s405_s7 = inlined_call_operand.vmem [shape: bf16[16,32], index: 7, kind: output, shape index: {}]  }
   0x1   :  { %278 = vmatprep.subr.bf16.mxu0 %v312_v0  ;;  %v300_v1 = vld [vmem:[%s398_s1 + $0x8] sm:$0xff]   ;;  %282 = vmatprep.mubr.msk.bf16.mxu0 %vm313_vm0, %v312_v0  ;;  %v301_v2 = vld [vmem:[%s398_s1] sm:$0xff]   ;;  %v303_v4 = vld [vmem:[%s400_s3 + $0x18] sm:$0xff]   ;;  %vm246_vm3 = vcmask 257024  }
   0x2   :  { %286 = vmatprep.subr.bf16.mxu1 %v312_v0  ;;  %294 = vmatprep.mubr.msk.bf16.mxu1 %vm313_vm0, %v312_v0  ;;  %v27_v3 = vld [vmem:[%s399_s0] sm:$0xff]   ;;  %v304_v5 = vld [vmem:[%s400_s3 + $0x10] sm:$0xff]   ;;  %v305_v6 = vld [vmem:[%s400_s3 + $0x8] sm:$0xff]  }
   0x3   :  { %279 = vmatpush3.bf16.msra.mxu0 %v300_v1  ;;  %287 = vmatpush3.bf16.msra.mxu1 %v303_v4  ;;  %v306_v7 = vld [vmem:[%s400_s3] sm:$0xff]   ;;  %v189_v19 = vunpack.c.l.bf16 %v27_v3  ;;  %v190_v24 = vunpack.c.h.bf16 %v27_v3 }
   0x4   :  { %280 = vmatprep.subr.bf16.mxu0 %v312_v0  ;;  %288 = vmatprep.subr.bf16.mxu1 %v312_v0  ;;  %v253_v8 = vld [vmem:[%s401_s2] ss:$0 sm:$0xff] }
   0x5   :  { %v258_v18 = vld [vmem:[%s402_s4] ss:$0 sm:$0xff] }
   0x6   :  { %v264_v48 = vld [vmem:[%s403_s5] ss:$0 sm:$0xff] }
   0x7   :  { %281 = vmatpush3.bf16.msra.mxu0 %v301_v2  ;;  %289 = vmatpush3.bf16.msra.mxu1 %v304_v5  ;;  %v265_v50 = vld [vmem:[%s404_s6] ss:$0 sm:$0xff] }
   0x8   :  { %290 = vmatprep.subr.bf16.mxu1 %v312_v0 }
   0xa   :  { %283 = vmatmul.mubr.msk.bf16.vlgmr.msra.gmra.mxu0 %vm57_vm1, %v27_v3 }
   0xb   :  { %291 = vmatpush3.bf16.msra.mxu1 %v305_v6 }
   0xc   :  { %292 = vmatprep.subr.bf16.mxu1 %v312_v0 }
   0xf   :  { %293 = vmatpush3.bf16.msra.mxu1 %v306_v7 }
  0xca   :  { %v95_v9 = vpop.f32.mrf.mxu0 }
  0xcb   :  { %v96_v11 = vadd.f32 %v253_v8, %v95_v9 }
  0xcc   :  { %v284_v10 = vpop.f32.mrf.mxu0 }
  0xcd   :  { %v102_v15 = vmax.f32 %v96_v11, 0.0 }
  0xce   :  { %v98_v12 = vpop.f32.mrf.mxu0 }
  0xcf   :  { %v99_v13 = vadd.f32 %v253_v8, %v98_v12 }
  0xd0   :  { %v285_v14 = vpop.f32.mrf.mxu0 }
  0xd1   :  { %v103_v16 = vmax.f32 %v99_v13, 0.0 }
  0xd3   :  { %v104_v17 = vpack.c.bf16 %v103_v16, %v102_v15 }
  0xd5   :  { %295 = vmatmul.mubr.msk.bf16.vlgmr.msra.gmra.mxu1 %vm144_vm2, %v104_v17 }
 0x195   :  { %v182_v20 = vpop.f32.mrf.mxu1 }
 0x196   :  { %v183_v21 = vadd.f32 %v258_v18, %v182_v20 }
 0x197   :  { %v296_v22 = vpop.f32.mrf.mxu1 }
 0x198   :  { %v191_v23 = vadd.f32 %v189_v19, %v183_v21 }
 0x199   :  { %v185_v25 = vpop.f32.mrf.mxu1 }
 0x19a   :  { %v186_v26 = vadd.f32 %v258_v18, %v185_v25  ;;  %v195_v27 = vsel %vm57_vm1, %v191_v23, 0.0 }
 0x19b   :  { %196 = vadd.xlane.f32.xlu0 %v195_v27  ;;  %v297_v28 = vpop.f32.mrf.mxu1 }
 0x19c   :  { %v192_v29 = vadd.f32 %v190_v24, %v186_v26 }
 0x19e   :  { %v198_v30 = vsel %vm57_vm1, %v192_v29, 0.0 }
 0x19f   :  { %199 = vadd.xlane.f32.xlu0 %v198_v30 }
 0x224   :  { %v197_v31 = vpop.xlane.xlu0 %196 }
 0x225   :  { %v202_v32 = vmul.f32 0.03125, %v197_v31 }
 0x227   :  { %v204_v33 = vsub.f32 %v191_v23, %v202_v32 }
 0x228   :  { %v200_v34 = vpop.xlane.xlu0 %199 }
 0x229   :  { %v203_v35 = vmul.f32 0.03125, %v200_v34  ;;  %v206_v36 = vmul.f32 %v204_v33, %v204_v33 }
 0x22b   :  { %v205_v37 = vsub.f32 %v192_v29, %v203_v35  ;;  %v208_v38 = vsel %vm57_vm1, %v206_v36, 0.0 }
 0x22c   :  { %209 = vadd.xlane.f32.xlu1 %v208_v38 }
 0x22d   :  { %v207_v39 = vmul.f32 %v205_v37, %v205_v37 }
 0x22f   :  { %v211_v40 = vsel %vm57_vm1, %v207_v39, 0.0 }
 0x230   :  { %212 = vadd.xlane.f32.xlu1 %v211_v40 }
 0x2b5   :  { %v210_v41 = vpop.xlane.xlu1 %209 }
 0x2b6   :  { %v214_v42 = vmul.f32 0.03125, %v210_v41 }
 0x2b8   :  { %v216_v43 = vadd.f32 1e-05, %v214_v42 }
 0x2b9   :  { %v213_v44 = vpop.xlane.xlu1 %212 }
 0x2ba   :  { %308 = vrsqrt.f32 %v216_v43  ;;  %v215_v45 = vmul.f32 0.03125, %v213_v44 }
 0x2bc   :  { %v217_v46 = vadd.f32 1e-05, %v215_v45 }
 0x2be   :  { %310 = vrsqrt.f32 %v217_v46 }
 0x2c7   :  { %v309_v47 = vpop.eup %308 }
 0x2c8   :  { %v220_v49 = vmul.f32 %v309_v47, %v204_v33 }
 0x2ca   :  { %v228_v51 = vmul.f32 %v264_v48, %v220_v49 }
 0x2cb   :  { %v311_v52 = vpop.eup %310 }
 0x2cc   :  { %v236_v53 = vadd.f32 %v265_v50, %v228_v51  ;;  %v221_v54 = vmul.f32 %v311_v52, %v205_v37 }
 0x2ce   :  { %v268_v55 = vpack.c.bf16 %v236_v53, %v236_v53  ;;  %v229_v56 = vmul.f32 %v264_v48, %v221_v54 }
 0x2d0   :  { %247 = vst.msk [vmem:[%s405_s7] sm:$0xf] %vm246_vm3, %v268_v55  ;;  %v237_v57 = vadd.f32 %v265_v50, %v229_v56 }
 0x2d2   :  { %v269_v58 = vpack.c.bf16 %v237_v57, %v237_v57 }
 0x2d4   :  { %248 = vst.msk [vmem:[%s405_s7 + $0x4] sm:$0xf] %vm246_vm3, %v269_v58 }

// kernel: encoder_decoder_forward.49
= control target key start
LH: loop header
LB: loop body
LE: loop exit
PB: predicated region body
PF: predicated region fallthrough
CT: control target
= control target key end

     0   :  { %v156_v1 = vmov 0.0   ;;  %vm157_vm0 = vmmov 0   ;;  %s196_s0 = inlined_call_operand.vmem [shape: bf16[16,32], index: 0, kind: input, shape index: {}]   ;;  %s197_s1 = inlined_call_operand.vmem [shape: bf16[32,16], index: 1, kind: input, shape index: {}]   ;;  %s198_s2 = inlined_call_operand.vmem [shape: f32[1,16], index: 2, kind: input, shape index: {}]   ;;  %s199_s3 = inlined_call_operand.hbm [shape: f32[16,16], index: 3, kind: output, shape index: {}]  }
   0x1   :  { %v131_v0 = vld [vmem:[%s197_s1 + $0x8] sm:$0xff]   ;;  %118 = vmatprep.subr.bf16.mxu0 %v156_v1  ;;  %v132_v2 = vld [vmem:[%s197_s1] sm:$0xff]   ;;  %122 = vmatprep.mubr.msk.bf16.mxu0 %vm157_vm0, %v156_v1 }
   0x2   :  { %119 = vmatpush3.bf16.msra.mxu0 %v131_v0 }
   0x3   :  { %120 = vmatprep.subr.bf16.mxu0 %v156_v1 }
   0x4   :  { %8 = vsyncpa [#allocation3], 0  ;;  %v133_v3 = vld [vmem:[%s196_s0] sm:$0xff]   ;;  %vm46_vm1 = vcmask 261120   ;;  %vm91_vm2 = vcmask 130048   ;;  %s158_s20 = smov [#allocation2]  }
   0x5   :  { %v110_v4 = vld [vmem:[%s198_s2] ss:$0 sm:$0xff]  ;;  %s99_s1 = sshll.u32 %s158_s20, 4  ;;  %s100_s1 = int_to_ptr.vmem [resolvable:$true] %s99_s1 }
   0x6   :  { %121 = vmatpush3.bf16.msra.mxu0 %v132_v2  ;;  %s134_s0 = scalar_lea.vmem %s100_s1, 256  ;;  %p139_p1 = scmp.lt.s32.totalorder %s100_s1, %s100_s1 }
   0x7   :  { %p135_p0 = scmp.ne.s32.totalorder %s100_s1, %s134_s0  ;;  %p140_p2 = scmp.lt.s32.totalorder %s134_s0, %s134_s0 }
   0x9   :  { %123 = vmatmul.mubr.msk.bf16.vlgmr.msra.gmra.mxu0 %vm46_vm1, %v133_v3  ;;  %p141_p3 = por %p140_p2, %p139_p1 }
   0xb   :  { %p142_p4 = pnand %p141_p3, %p135_p0 }
  0xc9   :  { %v84_v5 = vpop.f32.mrf.mxu0 }
  0xca   :  { %v85_v6 = vadd.f32 %v110_v4, %v84_v5 }
  0xcb   :  { %v124_v7 = vpop.f32.mrf.mxu0 }
  0xcc   :  { %92 = vst.msk [vmem:[#allocation2] sm:$0xff] %vm91_vm2, %v85_v6 }
  0xcd   :  { %v87_v8 = vpop.f32.mrf.mxu0 }
  0xce   :  { %v88_v9 = vadd.f32 %v110_v4, %v87_v8 }
  0xcf   :  { %v125_v10 = vpop.f32.mrf.mxu0 }
  0xd0   :  { %93 = vst.msk [vmem:[#allocation2 + $0x8] sm:$0xff] %vm91_vm2, %v88_v9 }
  0xd1   :  { %145 = shalt.err (!%p142_p4)
}
  0xd2   :  { %s159_s2 = smov 128   ;;  %s160_s21 = smov 8  }
  0xd3   :  { %105 = dma.vmem_to_hbm [thread:$0]  %s100_s1, 256, %s199_s3, [#allocation3], %s159_s2, %s159_s2, %s160_s21  }
  0xd4   :  { %154 = dma.done.wait [#allocation3], 256  }
  0xd5   :  { %155 = vsyncadd [#allocation3], 4294967040 }
  0xd6   :  { %109 = vsyncpa [#allocation3], 1 }

</bundles_post_ra>
